<compile_context>
chip_gen: v7x
topology: tpu7x:2x2x1
jax: 0.10.0
libtpu: 0.0.40
codegen_flags: <defaults>
</compile_context>

<pallas_src>
import jax
import jax.numpy as jnp
from jax.experimental import pallas as pl
from jax.experimental.pallas import tpu as pltpu


# ----------------------------- Pallas kernel ---------------------------------
def _bool2probs_kernel(mask_ref, out_ref):
    # mask_ref: (tile_rows, 128) int8, values are 0 (False) or 1 (True)
    # out_ref : (tile_rows, 128) float32
    m = mask_ref[...].astype(jnp.float32)                  # 0.0 or 1.0
    out_ref[...] = jnp.float32(0.01) + jnp.float32(0.98) * m  # 0.01 / 0.99


_LANE = 128
_MIN_TILE_ROWS = 32        # int8 native sublane tiling is (32, 128)
_MAX_TILE_ROWS = 2048      # 2048*128 elems/step: 256 KiB in (i8) + 1 MiB out (f32)
_SMALL_FALLBACK_ELEMS = 64 * 1024


def _round_up(x: int, m: int) -> int:
    return ((x + m - 1) // m) * m


def bool2probs_pallas(bool_tensor: jax.Array, *, force_pallas: bool = False) -> jax.Array:
    """Elementwise torch.where(bool_tensor, 0.99, 0.01) on TPU via Pallas.

    Contract: input is a Boolean tensor.  Non-bool inputs are treated with
    truthiness semantics (nonzero -> True), matching torch.where.
    """
    orig_shape = bool_tensor.shape
    n = int(bool_tensor.size)

    if n == 0:
        return jnp.zeros(orig_shape, jnp.float32)

    # Small-input fast path: pallas_call launch + glue would dominate; let XLA
    # fuse a plain where into surrounding ops instead.
    if (not force_pallas) and n < _SMALL_FALLBACK_ELEMS:
        return jnp.where(bool_tensor, jnp.float32(0.99), jnp.float32(0.01))

    # Truthiness guard for non-bool inputs, then keep the mask narrow (int8).
    mask = bool_tensor if bool_tensor.dtype == jnp.bool_ else (bool_tensor != 0)
    flat = mask.reshape(-1).astype(jnp.int8)

    # Tile selection: largest tile <= _MAX_TILE_ROWS rows, multiple of 32 rows,
    # and split into >= 2 grid steps when the input allows (v7x: 2 TCs/chip).
    rows_needed = pl.cdiv(n, _LANE)
    tile_rows = _round_up(pl.cdiv(rows_needed, 2), _MIN_TILE_ROWS)
    tile_rows = max(_MIN_TILE_ROWS, min(_MAX_TILE_ROWS, tile_rows))
    grid_steps = pl.cdiv(rows_needed, tile_rows)
    rows_padded = grid_steps * tile_rows

    # Pad the ragged tail only when needed (zeros -> 0.01, sliced off below).
    pad = rows_padded * _LANE - n
    if pad:
        flat = jnp.pad(flat, (0, pad))
    x2d = flat.reshape(rows_padded, _LANE)

    out2d = pl.pallas_call(
        _bool2probs_kernel,
        out_shape=jax.ShapeDtypeStruct((rows_padded, _LANE), jnp.float32),
        grid=(grid_steps,),
        in_specs=[pl.BlockSpec((tile_rows, _LANE), lambda i: (i, 0))],
        out_specs=pl.BlockSpec((tile_rows, _LANE), lambda i: (i, 0)),
        compiler_params=pltpu.CompilerParams(
            dimension_semantics=("parallel",)),
    )(x2d)

    out_flat = out2d.reshape(-1)
    if pad:
        out_flat = out_flat[:n]
    return out_flat.reshape(orig_shape)


# --------------------------- Module equivalent --------------------------------
class ValuationFunction:
    """JAX/Pallas equivalent of the abstract PyTorch ValuationFunction."""

    def __init__(self, pred_name: str):
        self.pred_name = pred_name  # no learnable parameters in the module

    def forward(self, **kwargs):
        # Abstract in the reference module as well; concrete subclasses define it.
        # TODO(synk): base class has no forward body to translate.
        raise NotImplementedError()

    def bool2probs(self, bool_tensor: jax.Array) -> jax.Array:
        return bool2probs_pallas(bool_tensor)


# --------------------------------- main ---------------------------------------
if __name__ == "__main__":
    k_small, k_large = jax.random.split(jax.random.PRNGKey(0))
    vf = ValuationFunction("synthetic_pred")

    # Small NCHW Boolean input consistent with valuation-module usage.
    # This goes through the small-input jnp.where fast path.
    x_small = jax.random.uniform(k_small, (2, 4, 16, 16)) > 0.5
    p_small = jax.block_until_ready(vf.bool2probs(x_small))
    ref_small = jnp.where(x_small, jnp.float32(0.99), jnp.float32(0.01))
    assert p_small.shape == x_small.shape and p_small.dtype == jnp.float32
    assert bool(jnp.allclose(p_small, ref_small))

    # Same small input forced through the Pallas kernel (exercises the padded
    # ragged-tail path).
    p_forced = jax.block_until_ready(bool2probs_pallas(x_small, force_pallas=True))
    assert p_forced.shape == x_small.shape and p_forced.dtype == jnp.float32
    assert bool(jnp.allclose(p_forced, ref_small))

    # Larger Boolean input that takes the Pallas path with a multi-step grid
    # (rows=1024 -> tile_rows=512, grid=(2,), splittable across v7x's 2 TCs).
    x_large = jax.random.uniform(k_large, (8, 4, 64, 64)) > 0.5
    p_large = jax.block_until_ready(vf.bool2probs(x_large))
    ref_large = jnp.where(x_large, jnp.float32(0.99), jnp.float32(0.01))
    assert p_large.shape == x_large.shape and p_large.dtype == jnp.float32
    assert bool(jnp.allclose(p_large, ref_large))

    print("KERNEL_OK")
</pallas_src>

<mosaic_0001>
module attributes {stable_mosaic.version = 11 : i64} {
  func.func @_bool2probs_kernel(%arg0: i32, %arg1: memref<32x128xi8, #tpu.memory_space<vmem>>, %arg2: memref<32x128xf32, #tpu.memory_space<vmem>>) attributes {dimension_semantics = [#tpu.dimension_semantics<parallel>], iteration_bounds = array<i64: 1>, scalar_prefetch = 0 : i64, scratch_operands = 0 : i64, tpu.core_type = #tpu.core_type<tc>, window_params = [{transform_indices = @transform_0, window_bounds = array<i64: 32, 128>}, {transform_indices = @transform_1, window_bounds = array<i64: 32, 128>}]} {
    %c0 = arith.constant 0 : index
    %c0_0 = arith.constant 0 : index
    %0 = vector.load %arg1[%c0, %c0_0] : memref<32x128xi8, #tpu.memory_space<vmem>>, vector<32x128xi8>
    %1 = arith.sitofp %0 : vector<32x128xi8> to vector<32x128xf32>
    %cst = arith.constant 9.800000e-01 : f32
    %2 = vector.broadcast %cst : f32 to vector<32x128xf32>
    %3 = arith.mulf %2, %1 : vector<32x128xf32>
    %cst_1 = arith.constant 0.00999999977 : f32
    %4 = vector.broadcast %cst_1 : f32 to vector<32x128xf32>
    %5 = arith.addf %4, %3 : vector<32x128xf32>
    %c0_2 = arith.constant 0 : index
    %c0_3 = arith.constant 0 : index
    %6 = vector.load %arg2[%c0_2, %c0_3] : memref<32x128xf32, #tpu.memory_space<vmem>>, vector<32x128xf32>
    tpu.vector_store %arg2[%c0_2, %c0_3], %5 {strides = array<i32>} : memref<32x128xf32, #tpu.memory_space<vmem>>, vector<32x128xf32>,
    return
  }
  func.func @transform_0(%arg0: i32) -> (i32, i32) {
    %c0_i32 = arith.constant 0 : i32
    %c0_i32_0 = arith.constant 0 : i32
    return %arg0, %c0_i32 : i32, i32
  }
  func.func @transform_1(%arg0: i32) -> (i32, i32) {
    %c0_i32 = arith.constant 0 : i32
    %c0_i32_0 = arith.constant 0 : i32
    return %arg0, %c0_i32 : i32, i32
  }
}

</mosaic_0001>

<bundles_post_ra>
// kernel: tpu_custom_call.1
= control target key start
LH: loop header
LB: loop body
LE: loop exit
PB: predicated region body
PF: predicated region fallthrough
CT: control target
= control target key end

     0   :  { %6 = vsyncpa [#allocation3], 0  ;;  %s149_s0 = inlined_call_operand.hbm [shape: s8[32,128], index: 0, kind: input, shape index: {}]   ;;  %s150_s1 = inlined_call_operand.hbm [shape: f32[32,128], index: 1, kind: output, shape index: {}]  }
   0x1   :  { %7 = vsyncpa [#allocation4], 0  ;;  %s111_s6 = smov [#allocation2]   ;;  %s63_s10 = scalar_lea.hbm %s149_s0, 128 }
   0x2   :  { %s14_s7 = sshll.u32 %s111_s6, 4  ;;  %p64_p0 = scmp.ne.s32.totalorder %s149_s0, %s63_s10  ;;  %s15_s7 = int_to_ptr.vmem [resolvable:$true] %s14_s7 }
   0x3   :  { %p67_p1 = scmp.lt.u32.totalorder %s63_s10, %s149_s0 }
   0x5   :  { %p69_p2 = pnand %p67_p1, %p64_p0 }
   0x7   :  { %72 = shalt.err (!%p69_p2)
}
   0x8   :  { %s73_s15 = scalar_lea.vmem %s15_s7, 128  ;;  %p78_p4 = scmp.lt.s32.totalorder %s15_s7, %s15_s7 }
   0x9   :  { %p74_p3 = scmp.ne.s32.totalorder %s15_s7, %s73_s15  ;;  %p79_p5 = scmp.lt.s32.totalorder %s73_s15, %s73_s15 }
   0xb   :  { %p80_p6 = por %p79_p5, %p78_p4 }
   0xd   :  { %p81_p7 = pnand %p80_p6, %p74_p3 }
   0xf   :  { %84 = shalt.err (!%p81_p7)
}
  0x10   :  { %17 = dma.hbm_to_vmem [thread:$0]  %s149_s0, 128, %s15_s7, [#allocation3]  }
  0x11   :  { %107 = dma.done.wait [#allocation3], 128  }
  0x12   :  { %108 = vsyncadd [#allocation3], 4294967168  ;;  %v21_v0 = vld [vmem:[#allocation2] sm:$0xff]  ;;  %s112_s18 = smov [#allocation5]  }
  0x13   :  { %v22_v1 = vunpack.c.0.s8 %v21_v0  ;;  %v23_v2 = vunpack.c.1.s8 %v21_v0  ;;  %v24_v3 = vunpack.c.2.s8 %v21_v0  ;;  %v25_v4 = vunpack.c.3.s8 %v21_v0  ;;  %s47_s19 = sshll.u32 %s112_s18, 4  ;;  %s48_s19 = int_to_ptr.vmem [resolvable:$true] %s47_s19 }
  0x14   :  { %s85_s0 = scalar_lea.vmem %s48_s19, 512  ;;  %p90_p9 = scmp.lt.s32.totalorder %s48_s19, %s48_s19 }
  0x15   :  { %v26_v5 = vcvt.s32.f32 %v22_v1  ;;  %v27_v6 = vcvt.s32.f32 %v23_v2  ;;  %v28_v7 = vcvt.s32.f32 %v24_v3  ;;  %v29_v8 = vcvt.s32.f32 %v25_v4  ;;  %p86_p8 = scmp.ne.s32.totalorder %s48_s19, %s85_s0  ;;  %p91_p10 = scmp.lt.s32.totalorder %s85_s0, %s85_s0 }
  0x17   :  { %v30_v9 = vmul.f32 0.98, %v26_v5  ;;  %v31_v10 = vmul.f32 0.98, %v27_v6  ;;  %v32_v11 = vmul.f32 0.98, %v28_v7  ;;  %p92_p11 = por %p91_p10, %p90_p9 }
  0x18   :  { %v33_v12 = vmul.f32 0.98, %v29_v8 }
  0x19   :  { %v34_v13 = vadd.f32 0.01, %v30_v9  ;;  %v35_v14 = vadd.f32 0.01, %v31_v10  ;;  %v36_v15 = vadd.f32 0.01, %v32_v11  ;;  %p93_p12 = pnand %p92_p11, %p86_p8 }
  0x1a   :  { %v37_v16 = vadd.f32 0.01, %v33_v12 }
  0x1b   :  { %38 = vst [vmem:[#allocation5] sm:$0xff] %v34_v13  ;;  %39 = vst [vmem:[#allocation5 + $0x8] sm:$0xff] %v35_v14 }
  0x1c   :  { %40 = vst [vmem:[#allocation5 + $0x10] sm:$0xff] %v36_v15  ;;  %41 = vst [vmem:[#allocation5 + $0x18] sm:$0xff] %v37_v16 }
  0x1d   :  { %96 = shalt.err (!%p93_p12)
}
  0x1e   :  { %s97_s22 = scalar_lea.hbm %s150_s1, 512 }
  0x1f   :  { %p98_p13 = scmp.ne.s32.totalorder %s150_s1, %s97_s22  ;;  %p101_p0 = scmp.lt.u32.totalorder %s97_s22, %s150_s1 }
  0x21   :  { %p103_p1 = pnand %p101_p0, %p98_p13 }
  0x23   :  { %106 = shalt.err (!%p103_p1)
}
  0x24   :  { %s113_s27 = smov 128   ;;  %s114_s28 = smov 8  }
  0x25   :  { %53 = dma.vmem_to_hbm [thread:$0]  %s48_s19, 512, %s150_s1, [#allocation4], %s113_s27, %s113_s27, %s114_s28  }
  0x26   :  { %109 = dma.done.wait [#allocation4], 512  }
  0x27   :  { %110 = vsyncadd [#allocation4], 4294966784 }
  0x28   :  { %57 = vsyncpa [#allocation3], 1 }
  0x29   :  { %58 = vsyncpa [#allocation4], 1 }

</bundles_post_ra>
